<compile_context>
chip_gen: v7x
topology: tpu7x:2x2x1
jax: 0.10.0
libtpu: 0.0.40
codegen_flags: <defaults>
</compile_context>

<pallas_src>
import functools

import jax
import jax.numpy as jnp
from jax.experimental import pallas as pl
from jax.experimental.pallas import tpu as pltpu


def _cond_entropy_kernel(x_ref, out_ref, *, true_b, tile_b):
    """x_ref: (tile_b, C) logits tile; out_ref: (1, 8, 128) per-tile partial."""
    i = pl.program_id(0)

    # Upcast feeds directly into the subtract/exp chain (no standalone f32
    # copy of x kept live; Mosaic fuses the convert into the elementwise pass).
    x = x_ref[...].astype(jnp.float32)                       # (tile_b, C)
    m = jnp.max(x, axis=1, keepdims=True)                    # (tile_b, 1)
    z = x - m
    e = jnp.exp(z)                                           # EUP slot
    s = jnp.sum(e, axis=1, keepdims=True)                    # (tile_b, 1)
    t = jnp.sum(e * z, axis=1, keepdims=True)                # (tile_b, 1)
    # per-row sum_c p*log p  ==  t/s - log(s).  Exact divide: it only touches
    # B elements, and the approx reciprocal previously broke 1e-4 tolerance.
    row = t / s - jnp.log(s)                                 # (tile_b, 1)

    # Mask rows past the true batch.  The last grid block may read past B
    # (no wrapper-side pad); the select neutralizes any NaN/inf from that
    # undefined tail, and per-row reductions keep it out of valid rows.
    ridx = i * tile_b + jax.lax.broadcasted_iota(jnp.int32, (tile_b, 1), 0)
    row = jnp.where(ridx < true_b, row, 0.0)

    # per-tile partial of  -sum_b sum_c p*log p  (lane-dense, unmasked store)
    partial = -jnp.sum(row)
    out_ref[...] = partial * jnp.ones((1, 8, 128), jnp.float32)


def _vmem_limits():
    """Returns (vmem_limit_bytes, per-step tile budget), per-generation."""
    cap = 64 << 20  # conservative default = v7x-class (smallest VMEM)
    try:
        cap = int(pltpu.get_tpu_info().vmem_capacity_bytes)
    except Exception:
        pass
    if cap >= (128 << 20):          # v5e / v6e: big scoped limit is load-bearing
        return 96 << 20, 72 << 20
    return 48 << 20, 36 << 20       # v7x: 64 MiB physical, leave headroom


def conditional_entropy_loss(x, *, tile_b=None):
    """Scalar loss:  -mean_b( sum_c softmax(x)*log_softmax(x) ),  x: (B, C)."""
    B, C = x.shape
    itemsize = x.dtype.itemsize
    vmem_limit, tile_budget = _vmem_limits()

    if tile_b is None:
        # ~8 MiB HBM bytes per grid step (>=85% of roofline per measured tile
        # table), bounded by VMEM: double-buffered (lane-padded) input block
        # plus ~5 full-tile f32 temporaries from the elementwise pass.
        c_pad = max(128, ((C + 127) // 128) * 128)
        bytes_per_row_vmem = c_pad * (2 * itemsize + 5 * 4)
        rows_vmem = tile_budget // bytes_per_row_vmem
        rows_hbm = (8 << 20) // max(1, C * itemsize)         # dtype-aware
        tile_b = int(max(8, min(rows_vmem, rows_hbm)))
        tile_b = max(8, (tile_b // 8) * 8)
        # never larger than the (sublane-rounded) batch itself
        tile_b = min(tile_b, max(8, ((B + 7) // 8) * 8))
        # megacore: if everything fits in one tile but the problem is sizable,
        # split it so both TensorCores (v7x) get work.
        if pl.cdiv(B, tile_b) == 1 and B * C * itemsize >= (2 << 20):
            tile_b = max(8, ((pl.cdiv(B, 2) + 7) // 8) * 8)
    else:
        tile_b = max(8, (int(tile_b) // 8) * 8)

    num_tiles = pl.cdiv(B, tile_b)

    cost = pl.CostEstimate(
        flops=6 * B * C,
        transcendentals=B * C + 2 * B,   # exp per element + log & divide per row
        bytes_accessed=int(B * C * itemsize + num_tiles * 8 * 128 * 4),
    )

    kernel = functools.partial(_cond_entropy_kernel, true_b=B, tile_b=tile_b)

    out = pl.pallas_call(
        kernel,
        out_shape=jax.ShapeDtypeStruct((num_tiles, 8, 128), jnp.float32),
        grid_spec=pltpu.PrefetchScalarGridSpec(
            num_scalar_prefetch=0,
            grid=(num_tiles,),
            in_specs=[pl.BlockSpec((tile_b, C), lambda i: (i, 0))],
            out_specs=pl.BlockSpec((1, 8, 128), lambda i: (i, 0, 0)),
        ),
        compiler_params=pltpu.CompilerParams(
            # independent per-tile partials -> safe to shard across TCs
            dimension_semantics=("parallel",),
            vmem_limit_bytes=vmem_limit,
        ),
        cost_estimate=cost,
    )(x)

    # final reduction + mean over the (true) batch in glue
    return (jnp.sum(out[:, 0, 0]) / B).astype(jnp.float32)

    # TODO(synk): for vocab-sized C (>32k) add a class-axis grid dimension
    # (online-softmax streaming); for classifier-sized C < 128 pack multiple
    # rows per 128-lane group to recover lane utilization.


def _reference(x):
    x = x.astype(jnp.float32)
    p = jax.nn.softmax(x, axis=1)
    logp = jax.nn.log_softmax(x, axis=1)
    b = jnp.sum(p * logp, axis=1)
    return -1.0 * jnp.mean(b, axis=0)


if __name__ == "__main__":
    key = jax.random.PRNGKey(0)

    # small logits matching the module's forward: batch=8, num_classes=32
    B, C = 8, 32
    x = jax.random.normal(key, (B, C), dtype=jnp.float32) * 3.0
    loss = jax.block_until_ready(conditional_entropy_loss(x))
    ref = _reference(x)
    assert jnp.allclose(loss, ref, atol=1e-4, rtol=1e-4), (loss, ref)

    # ragged batch + multi-tile path (exercises the un-padded tail mask and
    # per-tile parallel partials)
    B2, C2 = 50, 160
    x2 = jax.random.normal(jax.random.PRNGKey(1), (B2, C2), dtype=jnp.float32)
    loss2 = jax.block_until_ready(conditional_entropy_loss(x2, tile_b=16))
    ref2 = _reference(x2)
    assert jnp.allclose(loss2, ref2, atol=1e-4, rtol=1e-4), (loss2, ref2)

    print("KERNEL_OK")
</pallas_src>

<mosaic_0001>
module attributes {stable_mosaic.version = 11 : i64} {
  func.func @_cond_entropy_kernel(%arg0: i32, %arg1: memref<8x32xf32, #tpu.memory_space<vmem>>, %arg2: memref<1x8x128xf32, #tpu.memory_space<vmem>>) attributes {dimension_semantics = [#tpu.dimension_semantics<parallel>], iteration_bounds = array<i64: 1>, scalar_prefetch = 0 : i64, scratch_operands = 0 : i64, tpu.core_type = #tpu.core_type<tc>, window_params = [{transform_indices = @transform_0, window_bounds = array<i64: 8, 32>}, {transform_indices = @transform_1, window_bounds = array<i64: 1, 8, 128>}]} {
    %c0 = arith.constant 0 : index
    %c0_0 = arith.constant 0 : index
    %0 = vector.load %arg1[%c0, %c0_0] : memref<8x32xf32, #tpu.memory_space<vmem>>, vector<8x32xf32>
    %cst = arith.constant dense<0xFF800000> : vector<8xf32>
    %1 = vector.multi_reduction <maximumf>, %0, %cst [1] : vector<8x32xf32> to vector<8xf32>
    %2 = vector.shape_cast %1 : vector<8xf32> to vector<8x1xf32>
    %3 = vector.broadcast %2 : vector<8x1xf32> to vector<8x32xf32>
    %4 = arith.subf %0, %3 : vector<8x32xf32>
    %5 = math.exp %4 : vector<8x32xf32>
    %cst_1 = arith.constant dense<0.000000e+00> : vector<8xf32>
    %6 = vector.multi_reduction <add>, %5, %cst_1 [1] : vector<8x32xf32> to vector<8xf32>
    %7 = vector.shape_cast %6 : vector<8xf32> to vector<8x1xf32>
    %8 = arith.mulf %5, %4 : vector<8x32xf32>
    %cst_2 = arith.constant dense<0.000000e+00> : vector<8xf32>
    %9 = vector.multi_reduction <add>, %8, %cst_2 [1] : vector<8x32xf32> to vector<8xf32>
    %10 = vector.shape_cast %9 : vector<8xf32> to vector<8x1xf32>
    %11 = arith.divf %10, %7 : vector<8x1xf32>
    %12 = math.log %7 : vector<8x1xf32>
    %13 = arith.subf %11, %12 : vector<8x1xf32>
    %c8_i32 = arith.constant 8 : i32
    %14 = arith.muli %arg0, %c8_i32 : i32
    %15 = tpu.iota {dimensions = array<i32: 0>} : vector<8x1xi32>
    %16 = vector.broadcast %14 : i32 to vector<8x1xi32>
    %17 = arith.addi %16, %15 : vector<8x1xi32>
    %c8_i32_3 = arith.constant 8 : i32
    %18 = vector.broadcast %c8_i32_3 : i32 to vector<8x1xi32>
    %19 = arith.cmpi slt, %17, %18 : vector<8x1xi32>
    %cst_4 = arith.constant 0.000000e+00 : f32
    %20 = vector.broadcast %cst_4 : f32 to vector<8x1xf32>
    %21 = arith.select %19, %13, %20 : vector<8x1xi1>, vector<8x1xf32>
    %22 = vector.shape_cast %21 : vector<8x1xf32> to vector<1x8x1xf32>
    %cst_5 = arith.constant dense<0.000000e+00> : vector<1xf32>
    %23 = vector.multi_reduction <add>, %22, %cst_5 [1, 2] : vector<1x8x1xf32> to vector<1xf32>
    %24 = vector.shape_cast %23 : vector<1xf32> to vector<1x1x1xf32>
    %25 = vector.extract %24[0, 0, 0] : f32 from vector<1x1x1xf32>
    %cst_6 = arith.constant 0.000000e+00 : f32
    %26 = arith.subf %cst_6, %25 : f32
    %cst_7 = arith.constant 1.000000e+00 : f32
    %27 = vector.broadcast %cst_7 : f32 to vector<1x8x128xf32>
    %28 = vector.broadcast %26 : f32 to vector<1x8x128xf32>
    %29 = arith.mulf %28, %27 : vector<1x8x128xf32>
    %c0_8 = arith.constant 0 : index
    %c0_9 = arith.constant 0 : index
    %c0_10 = arith.constant 0 : index
    %30 = vector.load %arg2[%c0_8, %c0_9, %c0_10] : memref<1x8x128xf32, #tpu.memory_space<vmem>>, vector<1x8x128xf32>
    tpu.vector_store %arg2[%c0_8, %c0_9, %c0_10], %29 {strides = array<i32>} : memref<1x8x128xf32, #tpu.memory_space<vmem>>, vector<1x8x128xf32>,
    return
  }
  func.func @transform_0(%arg0: i32) -> (i32, i32) {
    %c0_i32 = arith.constant 0 : i32
    %c0_i32_0 = arith.constant 0 : i32
    return %arg0, %c0_i32 : i32, i32
  }
  func.func @transform_1(%arg0: i32) -> (i32, i32, i32) {
    %c0_i32 = arith.constant 0 : i32
    %c0_i32_0 = arith.constant 0 : i32
    %c0_i32_1 = arith.constant 0 : i32
    return %arg0, %c0_i32, %c0_i32_0 : i32, i32, i32
  }
}

</mosaic_0001>

<bundles_post_ra>
// kernel: tpu_custom_call.1
= control target key start
LH: loop header
LB: loop body
LE: loop exit
PB: predicated region body
PF: predicated region fallthrough
CT: control target
= control target key end

     0   :  { %6 = vsyncpa [#allocation3], 0  ;;  %s171_s0 = inlined_call_operand.hbm [shape: f32[8,32], index: 0, kind: input, shape index: {}]   ;;  %s172_s1 = inlined_call_operand.hbm [shape: f32[1,8,128], index: 1, kind: output, shape index: {}]  }
   0x1   :  { %7 = vsyncpa [#allocation4], 0  ;;  %s135_s6 = smov [#allocation2]   ;;  %s87_s10 = scalar_lea.hbm %s171_s0, 128 }
   0x2   :  { %s14_s7 = sshll.u32 %s135_s6, 4  ;;  %p88_p0 = scmp.ne.s32.totalorder %s171_s0, %s87_s10  ;;  %s15_s7 = int_to_ptr.vmem [resolvable:$true] %s14_s7 }
   0x3   :  { %p91_p1 = scmp.lt.u32.totalorder %s87_s10, %s171_s0 }
   0x5   :  { %p93_p2 = pnand %p91_p1, %p88_p0 }
   0x7   :  { %96 = shalt.err (!%p93_p2)
}
   0x8   :  { %s97_s15 = scalar_lea.vmem %s15_s7, 128  ;;  %p102_p4 = scmp.lt.s32.totalorder %s15_s7, %s15_s7 }
   0x9   :  { %p98_p3 = scmp.ne.s32.totalorder %s15_s7, %s97_s15  ;;  %p103_p5 = scmp.lt.s32.totalorder %s97_s15, %s97_s15 }
   0xb   :  { %p104_p6 = por %p103_p5, %p102_p4 }
   0xd   :  { %p105_p7 = pnand %p104_p6, %p98_p3 }
   0xf   :  { %108 = shalt.err (!%p105_p7)
}
  0x10   :  { %17 = dma.hbm_to_vmem [thread:$0]  %s171_s0, 128, %s15_s7, [#allocation3]  }
  0x11   :  { %131 = dma.done.wait [#allocation3], 128  }
  0x12   :  { %132 = vsyncadd [#allocation3], 4294967168  ;;  %vm22_vm0 = vcmask 261120   ;;  %v21_v0 = vld [vmem:[#allocation2] sm:$0xff]  ;;  %vm48_vm1 = vcmask 7168   ;;  %s136_s0 = smov [#allocation5]  }
  0x13   :  { %v23_v1 = vsel %vm22_vm0, %v21_v0, -inf  ;;  %s68_s18 = sshll.u32 %s136_s0, 4  ;;  %s69_s18 = int_to_ptr.vmem [resolvable:$true] %s68_s18 }
  0x14   :  { %24 = vmax.xlane.f32.xlu0 %v23_v1  ;;  %s109_s21 = scalar_lea.vmem %s69_s18, 128  ;;  %p114_p9 = scmp.lt.s32.totalorder %s69_s18, %s69_s18 }
  0x15   :  { %p110_p8 = scmp.ne.s32.totalorder %s69_s18, %s109_s21  ;;  %p115_p10 = scmp.lt.s32.totalorder %s109_s21, %s109_s21 }
  0x17   :  { %p116_p11 = por %p115_p10, %p114_p9 }
  0x19   :  { %p117_p12 = pnand %p116_p11, %p110_p8 }
  0xa1   :  { %v25_v2 = vpop.xlane.xlu0 %24 }
  0xa2   :  { %v26_v3 = vsub.f32 %v21_v0, %v25_v2 }
  0xa4   :  { %v27_v4 = vmul.f32 1.442695, %v26_v3 }
  0xa6   :  { %81 = vpow2.f32 %v27_v4 }
  0xb0   :  { %v82_v5 = vpop.eup %81 }
  0xb1   :  { %v29_v6 = vsel %vm22_vm0, %v82_v5, 0.0  ;;  %v32_v7 = vmul.f32 %v82_v5, %v26_v3 }
  0xb2   :  { %30 = vadd.xlane.f32.xlu0 %v29_v6 }
  0xb3   :  { %v33_v8 = vsel %vm22_vm0, %v32_v7, 0.0 }
  0xb4   :  { %34 = vadd.xlane.f32.xlu1 %v33_v8 }
 0x13f   :  { %v31_v9 = vpop.xlane.xlu0 %30 }
 0x140   :  { %83 = vrcp.f32 %v31_v9 }
 0x141   :  { %85 = vlog2.f32 %v31_v9  ;;  %v35_v11 = vpop.xlane.xlu1 %34 }
 0x14a   :  { %v84_v10 = vpop.eup %83 }
 0x14b   :  { %v86_v12 = vpop.eup %85  ;;  %v37_v13 = vmul.f32 %v84_v10, %v35_v11 }
 0x14c   :  { %v39_v14 = vmul.f32 0.6931472, %v86_v12 }
 0x14e   :  { %v40_v15 = vsub.f32 %v37_v13, %v39_v14 }
 0x150   :  { %v49_v16 = vsel %vm48_vm1, %v40_v15, 0.0 }
 0x151   :  { %50 = vadd.xlane.f32.xlu1 %v49_v16 }
 0x1de   :  { %v51_v17 = vpop.xlane.xlu1 %50 }
 0x1df   :  { %v52_v18 = vrot.slane %v51_v17, 4 }
 0x1e1   :  { %v53_v19 = vadd.f32 %v52_v18, %v51_v17 }
 0x1e3   :  { %v54_v20 = vrot.slane %v53_v19, 2 }
 0x1e5   :  { %v55_v21 = vadd.f32 %v54_v20, %v53_v19 }
 0x1e7   :  { %v56_v22 = vrot.slane %v55_v21, 1 }
 0x1e9   :  { %v57_v23 = vadd.f32 %v56_v22, %v55_v21 }
 0x1eb   :  { %77 = vpush %v57_v23 }
 0x21c   :  { %s78_s19 = spop %77 }
 0x21d   :  { %s59_s20 = ssub.f32 0.0, %s78_s19 }
 0x21f   :  { %v60_v24 = vstv %s59_s20 }
 0x220   :  { %61 = vst [vmem:[#allocation5] sm:$0xff] %v60_v24 }
 0x221   :  { %120 = shalt.err (!%p117_p12)
}
 0x222   :  { %s121_s24 = scalar_lea.hbm %s172_s1, 128 }
 0x223   :  { %p122_p13 = scmp.ne.s32.totalorder %s172_s1, %s121_s24  ;;  %p125_p0 = scmp.lt.u32.totalorder %s121_s24, %s172_s1 }
 0x225   :  { %p127_p1 = pnand %p125_p0, %p122_p13 }
 0x227   :  { %130 = shalt.err (!%p127_p1)
}
 0x228   :  { %71 = dma.vmem_to_hbm [thread:$0]  %s69_s18, 128, %s172_s1, [#allocation4]  }
 0x229   :  { %133 = dma.done.wait [#allocation4], 128  }
 0x22a   :  { %134 = vsyncadd [#allocation4], 4294967168 }
 0x22b   :  { %75 = vsyncpa [#allocation3], 1 }
 0x22c   :  { %76 = vsyncpa [#allocation4], 1 }

</bundles_post_ra>
